<compile_context>
chip_gen: v6e
topology: v6e:2x2x1
jax: 0.10.0
libtpu: 0.0.40
codegen_flags: <defaults>
</compile_context>

<pallas_src>
import functools

import jax
import jax.numpy as jnp
from jax.experimental import pallas as pl
from jax.experimental.pallas import tpu as pltpu

# ----------------------------------------------------------------------------
# architecture constants (SA-Net ResNet-50)
# ----------------------------------------------------------------------------
N_LABELS = 14
LAYERS = (3, 4, 6, 3)
PLANES = (64, 128, 256, 512)
EXPANSION = 4
SA_GROUPS = 64
BN_EPS = 1e-5
GN_EPS = 1e-5
LANE = 128


def _ru(x, m):
    return ((x + m - 1) // m) * m


def _row_tile(m, pref):
    """Row (sublane-ish) tiling for bf16 blocks: multiples of 16."""
    mp = _ru(m, 16)
    if mp >= pref:
        return _ru(m, pref), pref
    return mp, mp


def _div_tile(d, pref, mult=128):
    """Largest multiple of `mult` <= pref that divides d (d is a multiple of mult)."""
    t = min(pref, d)
    t -= t % mult
    while d % t:
        t -= mult
    return t


# ----------------------------------------------------------------------------
# Pallas kernels
# ----------------------------------------------------------------------------
def _mm_bias_kernel(a_ref, b_ref, bias_ref, o_ref, acc_ref, *, relu):
    """Tiled matmul with f32 accumulation and fused bias(+ReLU) epilogue."""
    @pl.when(pl.program_id(2) == 0)
    def _init():
        acc_ref[...] = jnp.zeros_like(acc_ref)

    acc_ref[...] += jnp.dot(a_ref[...], b_ref[...],
                            preferred_element_type=jnp.float32)

    @pl.when(pl.program_id(2) == pl.num_programs(2) - 1)
    def _finalize():
        y = acc_ref[...] + bias_ref[...]
        if relu:
            y = jnp.maximum(y, 0.0)
        o_ref[...] = y.astype(o_ref.dtype)


def _max9_kernel(*refs):
    """Element-wise max over the 9 pooling taps (row-tiled)."""
    o_ref = refs[-1]
    m = refs[0][...]
    for r in refs[1:-1]:
        m = jnp.maximum(m, r[...])
    o_ref[...] = m


def _sa_res_relu_kernel(x_ref, id_ref, mask_ref, cw_ref, cb_ref, sw_ref, sb_ref,
                        o_ref):
    """Fused SA (shuffle attention, per-channel form) + residual add + ReLU.

    The channel shuffle is folded into the preceding conv's weights, so the SA
    math here is purely per-channel: channel-attention branch (spatial mean) and
    spatial branch (per-channel GroupNorm) selected by a per-channel mask.
    """
    x = x_ref[0].astype(jnp.float32)                       # (HW, tc)
    idn = id_ref[0].astype(jnp.float32)
    mask = mask_ref[...]                                   # (1, tc)

    mu = jnp.mean(x, axis=0, keepdims=True)                # (1, tc)
    var = jnp.maximum(jnp.mean(x * x, axis=0, keepdims=True) - mu * mu, 0.0)

    chan_mod = 1.0 / (1.0 + jnp.exp(-(cw_ref[...] * mu + cb_ref[...])))      # (1, tc)
    gn = (x - mu) * jax.lax.rsqrt(var + GN_EPS)                              # (HW, tc)
    spat_mod = 1.0 / (1.0 + jnp.exp(-(sw_ref[...] * gn + sb_ref[...])))      # (HW, tc)

    mod = mask * chan_mod + (1.0 - mask) * spat_mod
    o_ref[0] = jnp.maximum(x * mod + idn, 0.0).astype(o_ref.dtype)


def _head_kernel(x_ref, w_ref, b_ref, o_ref):
    """Global average pool + Linear + Sigmoid (tiny; latency-bound, kept fused)."""
    x = x_ref[...].astype(jnp.float32)                     # (Np, HW, C)
    pooled = jnp.mean(x, axis=1)                           # (Np, C)
    y = jnp.dot(pooled, w_ref[...], preferred_element_type=jnp.float32) + b_ref[...]
    o_ref[...] = 1.0 / (1.0 + jnp.exp(-y))


# ----------------------------------------------------------------------------
# pallas_call wrappers (jitted per distinct shape / static config)
# ----------------------------------------------------------------------------
def matmul_bias_act(a, w, bias, cout, relu):
    """a: (M, K); w: (Kp, Np) bf16 pre-padded folded weight; bias: (1, Np) f32.
    Returns act(a @ w + bias)[:, :cout] in bf16."""
    M, K = a.shape
    Kp, Np = w.shape
    Mp, tm = _row_tile(M, 512)
    tk = _div_tile(Kp, 512)
    tn = _div_tile(Np, 256)
    a = jnp.pad(a.astype(jnp.bfloat16), ((0, Mp - M), (0, Kp - K)))
    out = pl.pallas_call(
        functools.partial(_mm_bias_kernel, relu=relu),
        out_shape=jax.ShapeDtypeStruct((Mp, Np), jnp.bfloat16),
        grid=(Mp // tm, Np // tn, Kp // tk),
        in_specs=[pl.BlockSpec((tm, tk), lambda i, j, k: (i, k)),
                  pl.BlockSpec((tk, tn), lambda i, j, k: (k, j)),
                  pl.BlockSpec((1, tn), lambda i, j, k: (0, j))],
        out_specs=pl.BlockSpec((tm, tn), lambda i, j, k: (i, j)),
        scratch_shapes=[pltpu.VMEM((tm, tn), jnp.float32)],
        compiler_params=pltpu.CompilerParams(
            dimension_semantics=("parallel", "parallel", "arbitrary")),
    )(a, w, bias)
    return out[:M, :cout]


@functools.partial(jax.jit,
                   static_argnames=("kh", "kw", "cout", "stride", "padding", "relu"))
def conv_bn_act(x, w, b, *, kh, kw, cout, stride, padding, relu):
    """Conv (bias=False) with eval-mode BN folded into (w, b); optional fused ReLU."""
    N, H, W, Cin = x.shape
    Ho = (H + 2 * padding - kh) // stride + 1
    Wo = (W + 2 * padding - kw) // stride + 1
    if padding > 0:
        x = jnp.pad(x, ((0, 0), (padding, padding), (padding, padding), (0, 0)))
    if kh == 1 and kw == 1:
        A = x[:, ::stride, ::stride, :].reshape(N * Ho * Wo, Cin)
    else:
        # TODO(synk): im2col materializes kh*kw shifted copies in HBM; replace with an
        # in-kernel tap-accumulating conv (K-grid over taps) to cut HBM traffic further.
        taps = [x[:, ki:ki + stride * (Ho - 1) + 1:stride,
                    kj:kj + stride * (Wo - 1) + 1:stride, :]
                for ki in range(kh) for kj in range(kw)]
        A = jnp.concatenate(taps, axis=-1).reshape(N * Ho * Wo, kh * kw * Cin)
    out = matmul_bias_act(A, w, b, cout, relu)
    return out.reshape(N, Ho, Wo, cout)


@jax.jit
def maxpool_3x3_s2_p1(x):
    N, H, W, C = x.shape
    Ho = (H - 1) // 2 + 1
    Wo = (W - 1) // 2 + 1
    Cp = _ru(C, LANE)
    xp = jnp.pad(x, ((0, 0), (1, 1), (1, 1), (0, Cp - C)),
                 constant_values=-jnp.inf)
    M = N * Ho * Wo
    Mp, tr = _row_tile(M, 512)
    taps = [jnp.pad(
                xp[:, ki:ki + 2 * (Ho - 1) + 1:2,
                      kj:kj + 2 * (Wo - 1) + 1:2, :].reshape(M, Cp),
                ((0, Mp - M), (0, 0)))
            for ki in range(3) for kj in range(3)]
    out = pl.pallas_call(
        _max9_kernel,
        out_shape=jax.ShapeDtypeStruct((Mp, Cp), x.dtype),
        grid=(Mp // tr,),
        in_specs=[pl.BlockSpec((tr, Cp), lambda i: (i, 0))] * 9,
        out_specs=pl.BlockSpec((tr, Cp), lambda i: (i, 0)),
        compiler_params=pltpu.CompilerParams(dimension_semantics=("parallel",)),
    )(*taps)
    return out[:M, :C].reshape(N, Ho, Wo, C)


@jax.jit
def sa_residual_relu(x, identity, mask, cw, cb, sw, sb):
    """out = relu(SA(x) + identity), with the channel shuffle pre-folded."""
    N, H, W, C = x.shape
    HW = H * W
    x3 = x.reshape(N, HW, C)
    id3 = identity.reshape(N, HW, C)
    tc = LANE
    act_spec = pl.BlockSpec((1, HW, tc), lambda n, j: (n, 0, j))
    vec_spec = pl.BlockSpec((1, tc), lambda n, j: (0, j))
    out = pl.pallas_call(
        _sa_res_relu_kernel,
        out_shape=jax.ShapeDtypeStruct((N, HW, C), x.dtype),
        grid=(N, C // tc),
        in_specs=[act_spec, act_spec, vec_spec, vec_spec, vec_spec, vec_spec, vec_spec],
        out_specs=act_spec,
        compiler_params=pltpu.CompilerParams(
            dimension_semantics=("parallel", "parallel")),
    )(x3, id3, mask, cw, cb, sw, sb)
    return out.reshape(N, H, W, C)


@functools.partial(jax.jit, static_argnames=("n_labels",))
def classifier_head(x, w, b, *, n_labels):
    """adaptive_avg_pool2d((1,1)) + flatten + Linear + Sigmoid, fused."""
    N, H, W, C = x.shape
    HW = H * W
    Np = _ru(N, 8)
    Lp = w.shape[1]
    x3 = jnp.pad(x.reshape(N, HW, C), ((0, Np - N), (0, 0), (0, 0)))
    out = pl.pallas_call(
        _head_kernel,
        out_shape=jax.ShapeDtypeStruct((Np, Lp), jnp.float32),
        grid=(1,),
        in_specs=[pl.BlockSpec((Np, HW, C), lambda i: (0, 0, 0)),
                  pl.BlockSpec((C, Lp), lambda i: (0, 0)),
                  pl.BlockSpec((1, Lp), lambda i: (0, 0))],
        out_specs=pl.BlockSpec((Np, Lp), lambda i: (0, 0)),
        compiler_params=pltpu.CompilerParams(dimension_semantics=("arbitrary",)),
    )(x3, w, b)
    return out[:N, :n_labels]


# ----------------------------------------------------------------------------
# parameter prep: synthetic deterministic weights, BN folded, shuffle folded,
# weights pre-padded to 128-lane multiples and cast to bf16 once.
# ----------------------------------------------------------------------------
def _make_sa_params(key, c):
    cg = c // SA_GROUPS          # per-group channels
    half = cg // 2
    kc, ks = jax.random.split(key)
    cweight = 0.1 * jax.random.normal(kc, (half,), jnp.float32)
    cbias = jnp.ones((half,), jnp.float32)
    sweight = 0.1 * jax.random.normal(ks, (half,), jnp.float32)
    sbias = jnp.ones((half,), jnp.float32)
    gnw = jnp.ones((half,), jnp.float32)    # GroupNorm affine defaults
    gnb = jnp.zeros((half,), jnp.float32)

    r = jnp.arange(c) % cg
    is_chan = r < half
    idx_c = jnp.where(is_chan, r, 0)
    idx_s = jnp.where(is_chan, 0, r - half)
    mask = is_chan.astype(jnp.float32)
    cw = jnp.where(is_chan, cweight[idx_c], 0.0)
    cb = jnp.where(is_chan, cbias[idx_c], 0.0)
    sw = jnp.where(is_chan, 0.0, (sweight * gnw)[idx_s])
    sb = jnp.where(is_chan, 0.0, (sweight * gnb + sbias)[idx_s])

    # channel_shuffle(groups=2) permutation: new[j] = old[P[j]]; SA is per-channel,
    # so the shuffle is folded into conv3's output channels + these vectors.
    j = jnp.arange(c)
    perm = (j % 2) * (c // 2) + j // 2
    pack = lambda v: v[perm].reshape(1, c).astype(jnp.float32)
    sa = {"mask": pack(mask), "cw": pack(cw), "cb": pack(cb),
          "sw": pack(sw), "sb": pack(sb)}
    return sa, perm


def make_params(key, n_labels=N_LABELS):
    keys = iter(jax.random.split(key, 512))

    def conv_bn(cout, cin, kh, kw, perm=None):
        fan_in = cin * kh * kw
        w = ((2.0 / fan_in) ** 0.5) * jax.random.normal(
            next(keys), (cout, cin, kh, kw), jnp.float32)
        kg, kb, km, kv = jax.random.split(next(keys), 4)
        gamma = jax.random.uniform(kg, (cout,), jnp.float32, 0.8, 1.2)
        beta = 0.1 * jax.random.normal(kb, (cout,), jnp.float32)
        mean = 0.1 * jax.random.normal(km, (cout,), jnp.float32)
        var = jax.random.uniform(kv, (cout,), jnp.float32, 0.5, 1.5)
        # fold eval-mode BN into conv weight/bias
        scale = gamma / jnp.sqrt(var + BN_EPS)
        wf = w * scale[:, None, None, None]
        bf = beta - mean * scale
        wm = jnp.transpose(wf, (2, 3, 1, 0)).reshape(kh * kw * cin, cout)
        if perm is not None:
            wm = wm[:, perm]
            bf = bf[perm]
        k, n = wm.shape
        kp, np_ = _ru(k, LANE), _ru(n, LANE)
        return {"w": jnp.pad(wm, ((0, kp - k), (0, np_ - n))).astype(jnp.bfloat16),
                "b": jnp.pad(bf, (0, np_ - n)).reshape(1, np_).astype(jnp.float32)}

    params = {"stem": conv_bn(64, 3, 7, 7)}
    inplanes = 64
    layers = []
    for li, (nblocks, planes) in enumerate(zip(LAYERS, PLANES)):
        blocks = []
        for bi in range(nblocks):
            stride = 1 if (li == 0 or bi > 0) else 2
            out_c = planes * EXPANSION
            sa, perm = _make_sa_params(next(keys), out_c)
            blk = {"conv1": conv_bn(planes, inplanes, 1, 1),
                   "conv2": conv_bn(planes, planes, 3, 3),
                   "conv3": conv_bn(out_c, planes, 1, 1, perm=perm),
                   "sa": sa}
            if stride != 1 or inplanes != out_c:
                blk["down"] = conv_bn(out_c, inplanes, 1, 1)
            blocks.append(blk)
            inplanes = out_c
        layers.append(blocks)
    params["layers"] = layers

    fcw = 0.01 * jax.random.normal(next(keys), (inplanes, n_labels), jnp.float32)
    lp = _ru(n_labels, LANE)
    params["fc_w"] = jnp.pad(fcw, ((0, 0), (0, lp - n_labels)))
    params["fc_b"] = jnp.zeros((1, lp), jnp.float32)
    return params


# ----------------------------------------------------------------------------
# forward pass (eval mode; matches SA_ResNet50.forward semantics)
# ----------------------------------------------------------------------------
def sa_resnet50_forward(params, x_nchw):
    x = jnp.transpose(x_nchw, (0, 2, 3, 1)).astype(jnp.bfloat16)     # NCHW -> NHWC
    st = params["stem"]
    x = conv_bn_act(x, st["w"], st["b"], kh=7, kw=7, cout=64,
                    stride=2, padding=3, relu=True)                  # conv1+bn1+relu
    x = maxpool_3x3_s2_p1(x)                                         # maxpool

    for li, (nblocks, planes) in enumerate(zip(LAYERS, PLANES)):
        for bi in range(nblocks):
            blk = params["layers"][li][bi]
            stride = 1 if (li == 0 or bi > 0) else 2
            out_c = planes * EXPANSION
            identity = x
            y = conv_bn_act(x, blk["conv1"]["w"], blk["conv1"]["b"],
                            kh=1, kw=1, cout=planes, stride=1, padding=0, relu=True)
            y = conv_bn_act(y, blk["conv2"]["w"], blk["conv2"]["b"],
                            kh=3, kw=3, cout=planes, stride=stride, padding=1,
                            relu=True)
            y = conv_bn_act(y, blk["conv3"]["w"], blk["conv3"]["b"],
                            kh=1, kw=1, cout=out_c, stride=1, padding=0, relu=False)
            if "down" in blk:
                identity = conv_bn_act(x, blk["down"]["w"], blk["down"]["b"],
                                       kh=1, kw=1, cout=out_c, stride=stride,
                                       padding=0, relu=False)
            sa = blk["sa"]
            x = sa_residual_relu(y, identity, sa["mask"], sa["cw"], sa["cb"],
                                 sa["sw"], sa["sb"])                 # SA + add + relu

    return classifier_head(x, params["fc_w"], params["fc_b"], n_labels=N_LABELS)


# ----------------------------------------------------------------------------
if __name__ == "__main__":
    key = jax.random.PRNGKey(0)
    pkey, xkey = jax.random.split(key)
    params = make_params(pkey, N_LABELS)
    # 3 input channels; 32x32 is the smallest size keeping every stage >= 1x1.
    x = jax.random.normal(xkey, (2, 3, 32, 32), jnp.float32)

    out = sa_resnet50_forward(params, x)
    out = jax.block_until_ready(out)

    assert out.shape == (2, N_LABELS)
    assert bool(jnp.all(jnp.isfinite(out)))
    assert bool(jnp.all((out >= 0.0) & (out <= 1.0)))
    print("KERNEL_OK")
</pallas_src>

<mosaic_0001>
module attributes {stable_mosaic.version = 11 : i64} {
  func.func @_mm_bias_kernel(%arg0: i32, %arg1: i32, %arg2: i32, %arg3: memref<512x256xbf16, #tpu.memory_space<vmem>>, %arg4: memref<256x128xbf16, #tpu.memory_space<vmem>>, %arg5: memref<1x128xf32, #tpu.memory_space<vmem>>, %arg6: memref<512x128xbf16, #tpu.memory_space<vmem>>, %arg7: memref<512x128xf32, #tpu.memory_space<vmem>>) attributes {dimension_semantics = [#tpu.dimension_semantics<parallel>, #tpu.dimension_semantics<parallel>, #tpu.dimension_semantics<arbitrary>], iteration_bounds = array<i64: 1, 1, 1>, scalar_prefetch = 0 : i64, scratch_operands = 1 : i64, tpu.core_type = #tpu.core_type<tc>, window_params = [{transform_indices = @transform_0, window_bounds = array<i64: 512, 256>}, {transform_indices = @transform_1, window_bounds = array<i64: 256, 128>}, {transform_indices = @transform_2, window_bounds = array<i64: 1, 128>}, {transform_indices = @transform_3, window_bounds = array<i64: 512, 128>}]} {
    %c0_i32 = arith.constant 0 : i32
    %0 = arith.cmpi eq, %arg2, %c0_i32 : i32
    %1 = arith.extui %0 : i1 to i32
    %c0_i32_0 = arith.constant 0 : i32
    %2 = arith.cmpi ne, %1, %c0_i32_0 : i32
    scf.if %2 {
      %cst_10 = arith.constant 0.000000e+00 : f32
      %12 = vector.broadcast %cst_10 : f32 to vector<512x128xf32>
      %c0_11 = arith.constant 0 : index
      %c0_12 = arith.constant 0 : index
      %13 = vector.load %arg7[%c0_11, %c0_12] : memref<512x128xf32, #tpu.memory_space<vmem>>, vector<512x128xf32>
      tpu.vector_store %arg7[%c0_11, %c0_12], %12 {strides = array<i32>} : memref<512x128xf32, #tpu.memory_space<vmem>>, vector<512x128xf32>,
    } else {
    }
    %c0 = arith.constant 0 : index
    %c0_1 = arith.constant 0 : index
    %3 = vector.load %arg7[%c0, %c0_1] : memref<512x128xf32, #tpu.memory_space<vmem>>, vector<512x128xf32>
    %c0_2 = arith.constant 0 : index
    %c0_3 = arith.constant 0 : index
    %4 = vector.load %arg3[%c0_2, %c0_3] : memref<512x256xbf16, #tpu.memory_space<vmem>>, vector<512x256xbf16>
    %c0_4 = arith.constant 0 : index
    %c0_5 = arith.constant 0 : index
    %5 = vector.load %arg4[%c0_4, %c0_5] : memref<256x128xbf16, #tpu.memory_space<vmem>>, vector<256x128xbf16>
    %cst = arith.constant dense<0.000000e+00> : vector<512x128xf32>
    %6 = tpu.matmul %4, %5, %cst {dimension_numbers = #tpu.dot_dimension_numbers<[1], [0], [0], [1], [0, 0, 1, 1], [], []>} : vector<512x256xbf16>, vector<256x128xbf16>, vector<512x128xf32> -> vector<512x128xf32>
    %7 = arith.addf %3, %6 : vector<512x128xf32>
    %c0_6 = arith.constant 0 : index
    %c0_7 = arith.constant 0 : index
    %8 = vector.load %arg7[%c0_6, %c0_7] : memref<512x128xf32, #tpu.memory_space<vmem>>, vector<512x128xf32>
    tpu.vector_store %arg7[%c0_6, %c0_7], %7 {strides = array<i32>} : memref<512x128xf32, #tpu.memory_space<vmem>>, vector<512x128xf32>,
    %c0_i32_8 = arith.constant 0 : i32
    %9 = arith.cmpi eq, %arg2, %c0_i32_8 : i32
    %10 = arith.extui %9 : i1 to i32
    %c0_i32_9 = arith.constant 0 : i32
    %11 = arith.cmpi ne, %10, %c0_i32_9 : i32
    scf.if %11 {
      %c0_10 = arith.constant 0 : index
      %c0_11 = arith.constant 0 : index
      %12 = vector.load %arg7[%c0_10, %c0_11] : memref<512x128xf32, #tpu.memory_space<vmem>>, vector<512x128xf32>
      %c0_12 = arith.constant 0 : index
      %c0_13 = arith.constant 0 : index
      %13 = vector.load %arg5[%c0_12, %c0_13] : memref<1x128xf32, #tpu.memory_space<vmem>>, vector<1x128xf32>
      %14 = vector.broadcast %13 : vector<1x128xf32> to vector<512x128xf32>
      %15 = arith.addf %12, %14 : vector<512x128xf32>
      %cst_14 = arith.constant 0.000000e+00 : f32
      %16 = vector.broadcast %cst_14 : f32 to vector<512x128xf32>
      %17 = arith.maximumf %15, %16 : vector<512x128xf32>
      %18 = arith.truncf %17 : vector<512x128xf32> to vector<512x128xbf16>
      %c0_15 = arith.constant 0 : index
      %c0_16 = arith.constant 0 : index
      %19 = vector.load %arg6[%c0_15, %c0_16] : memref<512x128xbf16, #tpu.memory_space<vmem>>, vector<512x128xbf16>
      tpu.vector_store %arg6[%c0_15, %c0_16], %18 {strides = array<i32>} : memref<512x128xbf16, #tpu.memory_space<vmem>>, vector<512x128xbf16>,
    } else {
    }
    return
  }
  func.func @transform_0(%arg0: i32, %arg1: i32, %arg2: i32) -> (i32, i32) {
    %c0_i32 = arith.constant 0 : i32
    return %arg0, %arg2 : i32, i32
  }
  func.func @transform_1(%arg0: i32, %arg1: i32, %arg2: i32) -> (i32, i32) {
    %c0_i32 = arith.constant 0 : i32
    return %arg2, %arg1 : i32, i32
  }
  func.func @transform_2(%arg0: i32, %arg1: i32, %arg2: i32) -> (i32, i32) {
    %c0_i32 = arith.constant 0 : i32
    %c0_i32_0 = arith.constant 0 : i32
    return %c0_i32, %arg1 : i32, i32
  }
  func.func @transform_3(%arg0: i32, %arg1: i32, %arg2: i32) -> (i32, i32) {
    %c0_i32 = arith.constant 0 : i32
    return %arg0, %arg1 : i32, i32
  }
}

</mosaic_0001>

<bundles_post_ra>
// kernel: conv_bn_act.1
= control target key start
LH: loop header
LB: loop body
LE: loop exit
PB: predicated region body
PF: predicated region fallthrough
CT: control target
= control target key end

     0   :  { %v2185_v1 = vmov 0   ;;  %s2553_s0 = inlined_call_operand.vmem [shape: bf16[512,256], index: 0, kind: input, shape index: {}]   ;;  %s2554_s1 = inlined_call_operand.vmem [shape: bf16[256,128], index: 1, kind: input, shape index: {}]   ;;  %s2555_s2 = inlined_call_operand.vmem [shape: f32[1,128], index: 2, kind: input, shape index: {}]   ;;  %s2556_s3 = inlined_call_operand.hbm [shape: bf16[512,128], index: 3, kind: output, shape index: {}]  }
   0x1   :  { %v2051_v0 = vld [vmem:[%s2554_s1 + $0x38] sm:$0xff]   ;;  %660 = vmatprep.subr.bf16.mxu0 %v2185_v1  ;;  %2015 = vmatprep.subr.bf16.mxu1 %v2185_v1  ;;  %v2052_v2 = vld [vmem:[%s2554_s1 + $0x30] sm:$0xff]   ;;  %v2053_v3 = vld [vmem:[%s2554_s1 + $0x28] sm:$0xff]  }
   0x2   :  { %661 = vmatpush1.bf16.msra.mxu0 %v2051_v0  ;;  %2031 = vmatpush1.bf16.msra.mxu1 %v2051_v0  ;;  %v2054_v4 = vld [vmem:[%s2554_s1 + $0x20] sm:$0xff]   ;;  %v2055_v5 = vld [vmem:[%s2554_s1 + $0x18] sm:$0xff]   ;;  %v2056_v7 = vld [vmem:[%s2554_s1 + $0x10] sm:$0xff]  }
   0x3   :  { %662 = vmatprep.subr.bf16.mxu0 %v2185_v1  ;;  %2016 = vmatprep.subr.bf16.mxu1 %v2185_v1  ;;  %v2069_v6 = vld [vmem:[%s2553_s0 + $0x4] ss:$8 sps:$4 sm:$0xff]   ;;  %v2059_v11 = vld [vmem:[%s2554_s1 + $0x78] sm:$0xff]   ;;  %v2060_v12 = vld [vmem:[%s2554_s1 + $0x70] sm:$0xff]  }
   0x4   :  { %v2072_v8 = vld [vmem:[%s2553_s0 + $0x104] ss:$8 sps:$4 sm:$0xff]   ;;  %692 = vmatprep.mubr.bf16.mxu0 %v2069_v6  ;;  %v2063_v15 = vld [vmem:[%s2554_s1 + $0x58] sm:$0xff]   ;;  %v2064_v16 = vld [vmem:[%s2554_s1 + $0x50] sm:$0xff]  }
   0x5   :  { %820 = vmatprep.mubr.bf16.mxu1 %v2072_v8  ;;  %v2057_v9 = vld [vmem:[%s2554_s1 + $0x8] sm:$0xff]   ;;  %v2058_v10 = vld [vmem:[%s2554_s1] sm:$0xff]  }
   0x6   :  { %663 = vmatpush1.bf16.msra.mxu0 %v2052_v2  ;;  %2032 = vmatpush1.bf16.msra.mxu1 %v2052_v2  ;;  %v2061_v13 = vld [vmem:[%s2554_s1 + $0x68] sm:$0xff]   ;;  %v2062_v14 = vld [vmem:[%s2554_s1 + $0x60] sm:$0xff]  }
   0x7   :  { %664 = vmatprep.subr.bf16.mxu0 %v2185_v1  ;;  %2017 = vmatprep.subr.bf16.mxu1 %v2185_v1  ;;  %v2065_v17 = vld [vmem:[%s2554_s1 + $0x48] sm:$0xff]   ;;  %v2066_v18 = vld [vmem:[%s2554_s1 + $0x40] sm:$0xff]  }
   0xa   :  { %665 = vmatpush1.bf16.msra.mxu0 %v2053_v3  ;;  %2033 = vmatpush1.bf16.msra.mxu1 %v2053_v3 }
   0xb   :  { %666 = vmatprep.subr.bf16.mxu0 %v2185_v1  ;;  %2018 = vmatprep.subr.bf16.mxu1 %v2185_v1 }
   0xe   :  { %667 = vmatpush1.bf16.msra.mxu0 %v2054_v4  ;;  %2034 = vmatpush1.bf16.msra.mxu1 %v2054_v4 }
   0xf   :  { %668 = vmatprep.subr.bf16.mxu0 %v2185_v1  ;;  %2019 = vmatprep.subr.bf16.mxu1 %v2185_v1 }
  0x12   :  { %669 = vmatpush1.bf16.msra.mxu0 %v2055_v5  ;;  %2035 = vmatpush1.bf16.msra.mxu1 %v2055_v5 }
  0x13   :  { %670 = vmatprep.subr.bf16.mxu0 %v2185_v1  ;;  %2020 = vmatprep.subr.bf16.mxu1 %v2185_v1 }
  0x16   :  { %671 = vmatpush1.bf16.msra.mxu0 %v2056_v7  ;;  %2036 = vmatpush1.bf16.msra.mxu1 %v2056_v7 }
  0x17   :  { %672 = vmatprep.subr.bf16.mxu0 %v2185_v1  ;;  %2021 = vmatprep.subr.bf16.mxu1 %v2185_v1 }
  0x1a   :  { %673 = vmatpush1.bf16.msra.mxu0 %v2057_v9  ;;  %2037 = vmatpush1.bf16.msra.mxu1 %v2057_v9 }
  0x1b   :  { %674 = vmatprep.subr.bf16.mxu0 %v2185_v1  ;;  %2022 = vmatprep.subr.bf16.mxu1 %v2185_v1 }
  0x1e   :  { %675 = vmatpush1.bf16.msra.mxu0 %v2058_v10  ;;  %2038 = vmatpush1.bf16.msra.mxu1 %v2058_v10 }
  0x1f   :  { %676 = vmatprep.subr.bf16.mxu0 %v2185_v1  ;;  %2023 = vmatprep.subr.bf16.mxu1 %v2185_v1 }
  0x22   :  { %677 = vmatpush2.bf16.msra.mxu0 %v2059_v11  ;;  %2039 = vmatpush2.bf16.msra.mxu1 %v2059_v11 }
  0x23   :  { %678 = vmatprep.subr.bf16.mxu0 %v2185_v1  ;;  %2024 = vmatprep.subr.bf16.mxu1 %v2185_v1 }
  0x26   :  { %679 = vmatpush2.bf16.msra.mxu0 %v2060_v12  ;;  %2040 = vmatpush2.bf16.msra.mxu1 %v2060_v12 }
  0x27   :  { %680 = vmatprep.subr.bf16.mxu0 %v2185_v1  ;;  %2025 = vmatprep.subr.bf16.mxu1 %v2185_v1 }
  0x2a   :  { %681 = vmatpush2.bf16.msra.mxu0 %v2061_v13  ;;  %2041 = vmatpush2.bf16.msra.mxu1 %v2061_v13 }
  0x2b   :  { %682 = vmatprep.subr.bf16.mxu0 %v2185_v1  ;;  %2026 = vmatprep.subr.bf16.mxu1 %v2185_v1 }
  0x2e   :  { %683 = vmatpush2.bf16.msra.mxu0 %v2062_v14  ;;  %2042 = vmatpush2.bf16.msra.mxu1 %v2062_v14 }
  0x2f   :  { %684 = vmatprep.subr.bf16.mxu0 %v2185_v1  ;;  %2027 = vmatprep.subr.bf16.mxu1 %v2185_v1 }
  0x32   :  { %685 = vmatpush2.bf16.msra.mxu0 %v2063_v15  ;;  %2043 = vmatpush2.bf16.msra.mxu1 %v2063_v15 }
  0x33   :  { %686 = vmatprep.subr.bf16.mxu0 %v2185_v1  ;;  %2028 = vmatprep.subr.bf16.mxu1 %v2185_v1 }
  0x36   :  { %687 = vmatpush2.bf16.msra.mxu0 %v2064_v16  ;;  %2044 = vmatpush2.bf16.msra.mxu1 %v2064_v16 }
  0x37   :  { %688 = vmatprep.subr.bf16.mxu0 %v2185_v1  ;;  %2029 = vmatprep.subr.bf16.mxu1 %v2185_v1 }
  0x3a   :  { %689 = vmatpush2.bf16.msra.mxu0 %v2065_v17  ;;  %2045 = vmatpush2.bf16.msra.mxu1 %v2065_v17 }
  0x3b   :  { %8 = vsyncpa [#allocation4], 0  ;;  %690 = vmatprep.subr.bf16.mxu0 %v2185_v1  ;;  %2030 = vmatprep.subr.bf16.mxu1 %v2185_v1  ;;  %v2067_v19 = vld [vmem:[%s2553_s0] ss:$8 sps:$4 sm:$0xff]   ;;  %v2073_v21 = vld [vmem:[%s2553_s0 + $0x14] ss:$8 sps:$4 sm:$0xff]  }
  0x3c   :  { %v2070_v20 = vld [vmem:[%s2553_s0 + $0x100] ss:$8 sps:$4 sm:$0xff]   ;;  %v2075_v22 = vld [vmem:[%s2553_s0 + $0x114] ss:$8 sps:$4 sm:$0xff]   ;;  %v2077_v23 = vld [vmem:[%s2553_s0 + $0x10] ss:$8 sps:$4 sm:$0xff]  }
  0x3d   :  { %v2078_v24 = vld [vmem:[%s2553_s0 + $0x110] ss:$8 sps:$4 sm:$0xff]   ;;  %v2079_v25 = vld [vmem:[%s2553_s0 + $0x24] ss:$8 sps:$4 sm:$0xff]   ;;  %v2083_v27 = vld [vmem:[%s2553_s0 + $0x20] ss:$8 sps:$4 sm:$0xff]  }
  0x3e   :  { %691 = vmatpush2.bf16.msra.mxu0 %v2066_v18  ;;  %2046 = vmatpush2.bf16.msra.mxu1 %v2066_v18  ;;  %v2081_v26 = vld [vmem:[%s2553_s0 + $0x124] ss:$8 sps:$4 sm:$0xff]   ;;  %v2084_v28 = vld [vmem:[%s2553_s0 + $0x120] ss:$8 sps:$4 sm:$0xff]   ;;  %v2085_v29 = vld [vmem:[%s2553_s0 + $0x34] ss:$8 sps:$4 sm:$0xff]  }
  0x3f   :  { %v2087_v30 = vld [vmem:[%s2553_s0 + $0x134] ss:$8 sps:$4 sm:$0xff]   ;;  %v2089_v31 = vld [vmem:[%s2553_s0 + $0x30] ss:$8 sps:$4 sm:$0xff]   ;;  %v2091_v33 = vld [vmem:[%s2553_s0 + $0x44] ss:$8 sps:$4 sm:$0xff]  }
  0x40   :  { %v2090_v32 = vld [vmem:[%s2553_s0 + $0x130] ss:$8 sps:$4 sm:$0xff]   ;;  %v2093_v34 = vld [vmem:[%s2553_s0 + $0x144] ss:$8 sps:$4 sm:$0xff]   ;;  %v2095_v35 = vld [vmem:[%s2553_s0 + $0x40] ss:$8 sps:$4 sm:$0xff]  }
  0x41   :  { %693 = vmatmul.mubr.bf16.vlgmr.msra.gmra.mxu0 %v2067_v19  ;;  %821 = vmatmul.mubr.bf16.vlgmr.msra.gmra.mxu1 %v2070_v20  ;;  %v2096_v36 = vld [vmem:[%s2553_s0 + $0x140] ss:$8 sps:$4 sm:$0xff]   ;;  %v2097_v37 = vld [vmem:[%s2553_s0 + $0x54] ss:$8 sps:$4 sm:$0xff]   ;;  %v2101_v39 = vld [vmem:[%s2553_s0 + $0x50] ss:$8 sps:$4 sm:$0xff]  }
  0x42   :  { %700 = vmatprep.mubr.bf16.mxu0 %v2073_v21  ;;  %828 = vmatprep.mubr.bf16.mxu1 %v2075_v22  ;;  %v2099_v38 = vld [vmem:[%s2553_s0 + $0x154] ss:$8 sps:$4 sm:$0xff]   ;;  %v2102_v40 = vld [vmem:[%s2553_s0 + $0x150] ss:$8 sps:$4 sm:$0xff]   ;;  %v2103_v41 = vld [vmem:[%s2553_s0 + $0x64] ss:$8 sps:$4 sm:$0xff]  }
  0x43   :  { %v2105_v42 = vld [vmem:[%s2553_s0 + $0x164] ss:$8 sps:$4 sm:$0xff]   ;;  %v2107_v43 = vld [vmem:[%s2553_s0 + $0x60] ss:$8 sps:$4 sm:$0xff]   ;;  %v2109_v45 = vld [vmem:[%s2553_s0 + $0x74] ss:$8 sps:$4 sm:$0xff]  }
  0x44   :  { %v2108_v44 = vld [vmem:[%s2553_s0 + $0x160] ss:$8 sps:$4 sm:$0xff]   ;;  %v2111_v46 = vld [vmem:[%s2553_s0 + $0x174] ss:$8 sps:$4 sm:$0xff]   ;;  %v2113_v47 = vld [vmem:[%s2553_s0 + $0x70] ss:$8 sps:$4 sm:$0xff]  }
  0x45   :  { %v2114_v48 = vld [vmem:[%s2553_s0 + $0x170] ss:$8 sps:$4 sm:$0xff]   ;;  %v2115_v49 = vld [vmem:[%s2553_s0 + $0x84] ss:$8 sps:$4 sm:$0xff]   ;;  %v2119_v51 = vld [vmem:[%s2553_s0 + $0x80] ss:$8 sps:$4 sm:$0xff]  }
  0x46   :  { %v2117_v50 = vld [vmem:[%s2553_s0 + $0x184] ss:$8 sps:$4 sm:$0xff]   ;;  %v2120_v52 = vld [vmem:[%s2553_s0 + $0x180] ss:$8 sps:$4 sm:$0xff]   ;;  %v2121_v53 = vld [vmem:[%s2553_s0 + $0x94] ss:$8 sps:$4 sm:$0xff]  }
  0x47   :  { %v2123_v54 = vld [vmem:[%s2553_s0 + $0x194] ss:$8 sps:$4 sm:$0xff]   ;;  %v2125_v55 = vld [vmem:[%s2553_s0 + $0x90] ss:$8 sps:$4 sm:$0xff]   ;;  %v2127_v57 = vld [vmem:[%s2553_s0 + $0xa4] ss:$8 sps:$4 sm:$0xff]  }
  0x48   :  { %v2126_v56 = vld [vmem:[%s2553_s0 + $0x190] ss:$8 sps:$4 sm:$0xff]   ;;  %v2129_v58 = vld [vmem:[%s2553_s0 + $0x1a4] ss:$8 sps:$4 sm:$0xff]   ;;  %v2131_v59 = vld [vmem:[%s2553_s0 + $0xa0] ss:$8 sps:$4 sm:$0xff]  }
  0x49   :  { %701 = vmatmul.mubr.bf16.gmra.mxu0 %v2077_v23  ;;  %829 = vmatmul.mubr.bf16.gmra.mxu1 %v2078_v24  ;;  %v2132_v60 = vld [vmem:[%s2553_s0 + $0x1a0] ss:$8 sps:$4 sm:$0xff]   ;;  %v2133_v61 = vld [vmem:[%s2553_s0 + $0xb4] ss:$8 sps:$4 sm:$0xff]   ;;  %v2137_v63 = vld [vmem:[%s2553_s0 + $0xb0] ss:$8 sps:$4 sm:$0xff]  }
  0x4a   :  { %708 = vmatprep.mubr.bf16.mxu0 %v2079_v25  ;;  %836 = vmatprep.mubr.bf16.mxu1 %v2081_v26  ;;  %v2135_v62 = vld [vmem:[%s2553_s0 + $0x1b4] ss:$8 sps:$4 sm:$0xff]   ;;  %v2138_v0 = vld [vmem:[%s2553_s0 + $0x1b0] ss:$8 sps:$4 sm:$0xff]   ;;  %v2139_v1 = vld [vmem:[%s2553_s0 + $0xc4] ss:$8 sps:$4 sm:$0xff]  }
  0x4b   :  { %v2141_v2 = vld [vmem:[%s2553_s0 + $0x1c4] ss:$8 sps:$4 sm:$0xff]   ;;  %v2143_v3 = vld [vmem:[%s2553_s0 + $0xc0] ss:$8 sps:$4 sm:$0xff]   ;;  %v2145_v5 = vld [vmem:[%s2553_s0 + $0xd4] ss:$8 sps:$4 sm:$0xff]  }
  0x4c   :  { %v2144_v4 = vld [vmem:[%s2553_s0 + $0x1c0] ss:$8 sps:$4 sm:$0xff]   ;;  %v2147_v6 = vld [vmem:[%s2553_s0 + $0x1d4] ss:$8 sps:$4 sm:$0xff]   ;;  %v2149_v7 = vld [vmem:[%s2553_s0 + $0xd0] ss:$8 sps:$4 sm:$0xff]  }
  0x4d   :  { %v2150_v8 = vld [vmem:[%s2553_s0 + $0x1d0] ss:$8 sps:$4 sm:$0xff]   ;;  %v2151_v9 = vld [vmem:[%s2553_s0 + $0xe4] ss:$8 sps:$4 sm:$0xff]   ;;  %v2155_v11 = vld [vmem:[%s2553_s0 + $0xe0] ss:$8 sps:$4 sm:$0xff]  }
  0x4e   :  { %v2153_v10 = vld [vmem:[%s2553_s0 + $0x1e4] ss:$8 sps:$4 sm:$0xff]   ;;  %v2156_v12 = vld [vmem:[%s2553_s0 + $0x1e0] ss:$8 sps:$4 sm:$0xff]   ;;  %v2157_v13 = vld [vmem:[%s2553_s0 + $0xf4] ss:$8 sps:$4 sm:$0xff]  }
  0x4f   :  { %v2159_v14 = vld [vmem:[%s2553_s0 + $0x1f4] ss:$8 sps:$4 sm:$0xff]   ;;  %v2161_v15 = vld [vmem:[%s2553_s0 + $0xf0] ss:$8 sps:$4 sm:$0xff]   ;;  %v2484_v18 = vld [vmem:[%s2555_s2] ss:$0 sm:$0xff] }
  0x50   :  { %v2162_v16 = vld [vmem:[%s2553_s0 + $0x1f0] ss:$8 sps:$4 sm:$0xff]   ;;  %s2186_s0 = smov [#allocation3]  }
  0x51   :  { %709 = vmatmul.mubr.bf16.gmra.mxu0 %v2083_v27  ;;  %837 = vmatmul.mubr.bf16.gmra.mxu1 %v2084_v28  ;;  %s1604_s2 = sshll.u32 %s2186_s0, 4  ;;  %s1605_s2 = int_to_ptr.vmem [resolvable:$true] %s1604_s2 }
  0x52   :  { %716 = vmatprep.mubr.bf16.mxu0 %v2085_v29  ;;  %844 = vmatprep.mubr.bf16.mxu1 %v2087_v30  ;;  %s2163_s7 = scalar_lea.vmem %s1605_s2, 4096  ;;  %p2168_p1 = scmp.lt.s32.totalorder %s1605_s2, %s1605_s2 }
  0x53   :  { %p2164_p0 = scmp.ne.s32.totalorder %s1605_s2, %s2163_s7  ;;  %p2169_p2 = scmp.lt.s32.totalorder %s2163_s7, %s2163_s7 }
  0x55   :  { %p2170_p3 = por %p2169_p2, %p2168_p1 }
  0x57   :  { %p2171_p4 = pnand %p2170_p3, %p2164_p0 }
  0x59   :  { %717 = vmatmul.mubr.bf16.gmra.mxu0 %v2089_v31  ;;  %845 = vmatmul.mubr.bf16.gmra.mxu1 %v2090_v32 }
  0x5a   :  { %724 = vmatprep.mubr.bf16.mxu0 %v2091_v33  ;;  %852 = vmatprep.mubr.bf16.mxu1 %v2093_v34 }
  0x61   :  { %725 = vmatmul.mubr.bf16.gmra.mxu0 %v2095_v35  ;;  %853 = vmatmul.mubr.bf16.gmra.mxu1 %v2096_v36 }
  0x62   :  { %732 = vmatprep.mubr.bf16.mxu0 %v2097_v37  ;;  %860 = vmatprep.mubr.bf16.mxu1 %v2099_v38 }
  0x69   :  { %733 = vmatmul.mubr.bf16.gmra.mxu0 %v2101_v39  ;;  %861 = vmatmul.mubr.bf16.gmra.mxu1 %v2102_v40 }
  0x6a   :  { %740 = vmatprep.mubr.bf16.mxu0 %v2103_v41  ;;  %868 = vmatprep.mubr.bf16.mxu1 %v2105_v42 }
  0x71   :  { %741 = vmatmul.mubr.bf16.gmra.mxu0 %v2107_v43  ;;  %869 = vmatmul.mubr.bf16.gmra.mxu1 %v2108_v44 }
  0x72   :  { %748 = vmatprep.mubr.bf16.mxu0 %v2109_v45  ;;  %876 = vmatprep.mubr.bf16.mxu1 %v2111_v46 }
  0x79   :  { %749 = vmatmul.mubr.bf16.gmra.mxu0 %v2113_v47  ;;  %877 = vmatmul.mubr.bf16.gmra.mxu1 %v2114_v48 }
  0x7a   :  { %756 = vmatprep.mubr.bf16.mxu0 %v2115_v49  ;;  %884 = vmatprep.mubr.bf16.mxu1 %v2117_v50 }
  0x81   :  { %757 = vmatmul.mubr.bf16.gmra.mxu0 %v2119_v51  ;;  %885 = vmatmul.mubr.bf16.gmra.mxu1 %v2120_v52 }
  0x82   :  { %764 = vmatprep.mubr.bf16.mxu0 %v2121_v53  ;;  %892 = vmatprep.mubr.bf16.mxu1 %v2123_v54 }
  0x89   :  { %765 = vmatmul.mubr.bf16.gmra.mxu0 %v2125_v55  ;;  %893 = vmatmul.mubr.bf16.gmra.mxu1 %v2126_v56 }
  0x8a   :  { %772 = vmatprep.mubr.bf16.mxu0 %v2127_v57  ;;  %900 = vmatprep.mubr.bf16.mxu1 %v2129_v58 }
  0x91   :  { %773 = vmatmul.mubr.bf16.gmra.mxu0 %v2131_v59  ;;  %901 = vmatmul.mubr.bf16.gmra.mxu1 %v2132_v60 }
  0x92   :  { %780 = vmatprep.mubr.bf16.mxu0 %v2133_v61  ;;  %908 = vmatprep.mubr.bf16.mxu1 %v2135_v62 }
  0x99   :  { %781 = vmatmul.mubr.bf16.gmra.mxu0 %v2137_v63  ;;  %909 = vmatmul.mubr.bf16.gmra.mxu1 %v2138_v0 }
  0x9a   :  { %788 = vmatprep.mubr.bf16.mxu0 %v2139_v1  ;;  %916 = vmatprep.mubr.bf16.mxu1 %v2141_v2 }
  0xa1   :  { %789 = vmatmul.mubr.bf16.gmra.mxu0 %v2143_v3  ;;  %917 = vmatmul.mubr.bf16.gmra.mxu1 %v2144_v4 }
  0xa2   :  { %796 = vmatprep.mubr.bf16.mxu0 %v2145_v5  ;;  %924 = vmatprep.mubr.bf16.mxu1 %v2147_v6 }
  0xa9   :  { %797 = vmatmul.mubr.bf16.gmra.mxu0 %v2149_v7  ;;  %925 = vmatmul.mubr.bf16.gmra.mxu1 %v2150_v8 }
  0xaa   :  { %804 = vmatprep.mubr.bf16.mxu0 %v2151_v9  ;;  %932 = vmatprep.mubr.bf16.mxu1 %v2153_v10 }
  0xb1   :  { %805 = vmatmul.mubr.bf16.gmra.mxu0 %v2155_v11  ;;  %933 = vmatmul.mubr.bf16.gmra.mxu1 %v2156_v12 }
  0xb2   :  { %812 = vmatprep.mubr.bf16.mxu0 %v2157_v13  ;;  %940 = vmatprep.mubr.bf16.mxu1 %v2159_v14 }
  0xb9   :  { %813 = vmatmul.mubr.bf16.gmra.mxu0 %v2161_v15  ;;  %941 = vmatmul.mubr.bf16.gmra.mxu1 %v2162_v16 }
 0x101   :  { %v694_v17 = vpop.f32.mrf.mxu0  ;;  %v822_v19 = vpop.f32.mrf.mxu1 }
 0x102   :  { %v1151_v22 = vadd.f32 %v2484_v18, %v694_v17  ;;  %v1183_v23 = vadd.f32 %v2484_v18, %v822_v19 }
 0x103   :  { %v696_v20 = vpop.f32.mrf.mxu0  ;;  %v824_v21 = vpop.f32.mrf.mxu1 }
 0x104   :  { %v1215_v30 = vmax.f32 %v1151_v22, 0.0  ;;  %v1247_v31 = vmax.f32 %v1183_v23, 0.0 }
 0x105   :  { %v697_v24 = vpop.f32.mrf.mxu0  ;;  %v825_v25 = vpop.f32.mrf.mxu1 }
 0x106   :  { %v1152_v26 = vadd.f32 %v2484_v18, %v697_v24  ;;  %v1184_v27 = vadd.f32 %v2484_v18, %v825_v25 }
 0x107   :  { %v699_v28 = vpop.f32.mrf.mxu0  ;;  %v827_v29 = vpop.f32.mrf.mxu1 }
 0x108   :  { %v1216_v32 = vmax.f32 %v1152_v26, 0.0  ;;  %v1248_v33 = vmax.f32 %v1184_v27, 0.0 }
 0x109   :  { %v702_v34 = vpop.f32.mrf.mxu0  ;;  %v830_v35 = vpop.f32.mrf.mxu1 }
 0x10a   :  { %v1827_v36 = vpack.c.bf16 %v1216_v32, %v1215_v30  ;;  %v1907_v37 = vpack.c.bf16 %v1248_v33, %v1247_v31  ;;  %v1153_v40 = vadd.f32 %v2484_v18, %v702_v34  ;;  %v1185_v41 = vadd.f32 %v2484_v18, %v830_v35 }
 0x10b   :  { %v704_v38 = vpop.f32.mrf.mxu0  ;;  %v832_v39 = vpop.f32.mrf.mxu1 }
 0x10c   :  { %1828 = vst [vmem:[#allocation3] sm:$0xff] %v1827_v36   ;;  %1999 = vst [vmem:[#allocation3 + $0x80] sm:$0xff] %v1907_v37   ;;  %v1217_v48 = vmax.f32 %v1153_v40, 0.0  ;;  %v1249_v49 = vmax.f32 %v1185_v41, 0.0 }
 0x10d   :  { %v705_v42 = vpop.f32.mrf.mxu0  ;;  %v833_v43 = vpop.f32.mrf.mxu1 }
 0x10e   :  { %v1154_v44 = vadd.f32 %v2484_v18, %v705_v42  ;;  %v1186_v45 = vadd.f32 %v2484_v18, %v833_v43 }
 0x10f   :  { %v707_v46 = vpop.f32.mrf.mxu0  ;;  %v835_v47 = vpop.f32.mrf.mxu1 }
 0x110   :  { %v1218_v50 = vmax.f32 %v1154_v44, 0.0  ;;  %v1250_v51 = vmax.f32 %v1186_v45, 0.0 }
 0x111   :  { %v710_v52 = vpop.f32.mrf.mxu0  ;;  %v838_v53 = vpop.f32.mrf.mxu1 }
 0x112   :  { %v1832_v54 = vpack.c.bf16 %v1218_v50, %v1217_v48  ;;  %v1912_v55 = vpack.c.bf16 %v1250_v51, %v1249_v49  ;;  %v1155_v58 = vadd.f32 %v2484_v18, %v710_v52  ;;  %v1187_v59 = vadd.f32 %v2484_v18, %v838_v53 }
 0x113   :  { %v712_v56 = vpop.f32.mrf.mxu0  ;;  %v840_v57 = vpop.f32.mrf.mxu1 }
 0x114   :  { %1984 = vst [vmem:[#allocation3 + $0x8] sm:$0xff] %v1832_v54   ;;  %2000 = vst [vmem:[#allocation3 + $0x88] sm:$0xff] %v1912_v55   ;;  %v1219_v2 = vmax.f32 %v1155_v58, 0.0  ;;  %v1251_v3 = vmax.f32 %v1187_v59, 0.0 }
 0x115   :  { %v713_v60 = vpop.f32.mrf.mxu0  ;;  %v841_v61 = vpop.f32.mrf.mxu1 }
 0x116   :  { %v1156_v62 = vadd.f32 %v2484_v18, %v713_v60  ;;  %v1188_v63 = vadd.f32 %v2484_v18, %v841_v61 }
 0x117   :  { %v715_v0 = vpop.f32.mrf.mxu0  ;;  %v843_v1 = vpop.f32.mrf.mxu1 }
 0x118   :  { %v1220_v4 = vmax.f32 %v1156_v62, 0.0  ;;  %v1252_v5 = vmax.f32 %v1188_v63, 0.0 }
 0x119   :  { %v718_v6 = vpop.f32.mrf.mxu0  ;;  %v846_v7 = vpop.f32.mrf.mxu1 }
 0x11a   :  { %v1837_v8 = vpack.c.bf16 %v1220_v4, %v1219_v2  ;;  %v1917_v9 = vpack.c.bf16 %v1252_v5, %v1251_v3  ;;  %v1157_v12 = vadd.f32 %v2484_v18, %v718_v6  ;;  %v1189_v13 = vadd.f32 %v2484_v18, %v846_v7 }
 0x11b   :  { %v720_v10 = vpop.f32.mrf.mxu0  ;;  %v848_v11 = vpop.f32.mrf.mxu1 }
 0x11c   :  { %1985 = vst [vmem:[#allocation3 + $0x10] sm:$0xff] %v1837_v8   ;;  %2001 = vst [vmem:[#allocation3 + $0x90] sm:$0xff] %v1917_v9   ;;  %v1221_v21 = vmax.f32 %v1157_v12, 0.0  ;;  %v1253_v22 = vmax.f32 %v1189_v13, 0.0 }
 0x11d   :  { %v721_v14 = vpop.f32.mrf.mxu0  ;;  %v849_v15 = vpop.f32.mrf.mxu1 }
 0x11e   :  { %v1158_v16 = vadd.f32 %v2484_v18, %v721_v14  ;;  %v1190_v17 = vadd.f32 %v2484_v18, %v849_v15 }
 0x11f   :  { %v723_v19 = vpop.f32.mrf.mxu0  ;;  %v851_v20 = vpop.f32.mrf.mxu1 }
 0x120   :  { %v1222_v23 = vmax.f32 %v1158_v16, 0.0  ;;  %v1254_v24 = vmax.f32 %v1190_v17, 0.0 }
 0x121   :  { %v726_v25 = vpop.f32.mrf.mxu0  ;;  %v854_v26 = vpop.f32.mrf.mxu1 }
 0x122   :  { %v1842_v27 = vpack.c.bf16 %v1222_v23, %v1221_v21  ;;  %v1922_v28 = vpack.c.bf16 %v1254_v24, %v1253_v22  ;;  %v1159_v31 = vadd.f32 %v2484_v18, %v726_v25  ;;  %v1191_v32 = vadd.f32 %v2484_v18, %v854_v26 }
 0x123   :  { %v728_v29 = vpop.f32.mrf.mxu0  ;;  %v856_v30 = vpop.f32.mrf.mxu1 }
 0x124   :  { %1986 = vst [vmem:[#allocation3 + $0x18] sm:$0xff] %v1842_v27   ;;  %2002 = vst [vmem:[#allocation3 + $0x98] sm:$0xff] %v1922_v28   ;;  %v1223_v39 = vmax.f32 %v1159_v31, 0.0  ;;  %v1255_v40 = vmax.f32 %v1191_v32, 0.0 }
 0x125   :  { %v729_v33 = vpop.f32.mrf.mxu0  ;;  %v857_v34 = vpop.f32.mrf.mxu1 }
 0x126   :  { %v1160_v35 = vadd.f32 %v2484_v18, %v729_v33  ;;  %v1192_v36 = vadd.f32 %v2484_v18, %v857_v34 }
 0x127   :  { %v731_v37 = vpop.f32.mrf.mxu0  ;;  %v859_v38 = vpop.f32.mrf.mxu1 }
 0x128   :  { %v1224_v41 = vmax.f32 %v1160_v35, 0.0  ;;  %v1256_v42 = vmax.f32 %v1192_v36, 0.0 }
 0x129   :  { %v734_v43 = vpop.f32.mrf.mxu0  ;;  %v862_v44 = vpop.f32.mrf.mxu1 }
 0x12a   :  { %v1847_v45 = vpack.c.bf16 %v1224_v41, %v1223_v39  ;;  %v1927_v46 = vpack.c.bf16 %v1256_v42, %v1255_v40  ;;  %v1161_v49 = vadd.f32 %v2484_v18, %v734_v43  ;;  %v1193_v50 = vadd.f32 %v2484_v18, %v862_v44 }
 0x12b   :  { %v736_v47 = vpop.f32.mrf.mxu0  ;;  %v864_v48 = vpop.f32.mrf.mxu1 }
 0x12c   :  { %1987 = vst [vmem:[#allocation3 + $0x20] sm:$0xff] %v1847_v45   ;;  %2003 = vst [vmem:[#allocation3 + $0xa0] sm:$0xff] %v1927_v46   ;;  %v1225_v57 = vmax.f32 %v1161_v49, 0.0  ;;  %v1257_v58 = vmax.f32 %v1193_v50, 0.0 }
 0x12d   :  { %v737_v51 = vpop.f32.mrf.mxu0  ;;  %v865_v52 = vpop.f32.mrf.mxu1 }
 0x12e   :  { %v1162_v53 = vadd.f32 %v2484_v18, %v737_v51  ;;  %v1194_v54 = vadd.f32 %v2484_v18, %v865_v52 }
 0x12f   :  { %v739_v55 = vpop.f32.mrf.mxu0  ;;  %v867_v56 = vpop.f32.mrf.mxu1 }
 0x130   :  { %v1226_v59 = vmax.f32 %v1162_v53, 0.0  ;;  %v1258_v60 = vmax.f32 %v1194_v54, 0.0 }
 0x131   :  { %v742_v61 = vpop.f32.mrf.mxu0  ;;  %v870_v62 = vpop.f32.mrf.mxu1 }
 0x132   :  { %v1852_v63 = vpack.c.bf16 %v1226_v59, %v1225_v57  ;;  %v1932_v0 = vpack.c.bf16 %v1258_v60, %v1257_v58  ;;  %v1163_v3 = vadd.f32 %v2484_v18, %v742_v61  ;;  %v1195_v4 = vadd.f32 %v2484_v18, %v870_v62 }
 0x133   :  { %v744_v1 = vpop.f32.mrf.mxu0  ;;  %v872_v2 = vpop.f32.mrf.mxu1 }
 0x134   :  { %1988 = vst [vmem:[#allocation3 + $0x28] sm:$0xff] %v1852_v63   ;;  %2004 = vst [vmem:[#allocation3 + $0xa8] sm:$0xff] %v1932_v0   ;;  %v1227_v11 = vmax.f32 %v1163_v3, 0.0  ;;  %v1259_v12 = vmax.f32 %v1195_v4, 0.0 }
 0x135   :  { %v745_v5 = vpop.f32.mrf.mxu0  ;;  %v873_v6 = vpop.f32.mrf.mxu1 }
 0x136   :  { %v1164_v7 = vadd.f32 %v2484_v18, %v745_v5  ;;  %v1196_v8 = vadd.f32 %v2484_v18, %v873_v6 }
 0x137   :  { %v747_v9 = vpop.f32.mrf.mxu0  ;;  %v875_v10 = vpop.f32.mrf.mxu1 }
 0x138   :  { %v1228_v13 = vmax.f32 %v1164_v7, 0.0  ;;  %v1260_v14 = vmax.f32 %v1196_v8, 0.0 }
 0x139   :  { %v750_v15 = vpop.f32.mrf.mxu0  ;;  %v878_v16 = vpop.f32.mrf.mxu1 }
 0x13a   :  { %v1857_v17 = vpack.c.bf16 %v1228_v13, %v1227_v11  ;;  %v1937_v19 = vpack.c.bf16 %v1260_v14, %v1259_v12  ;;  %v1165_v22 = vadd.f32 %v2484_v18, %v750_v15  ;;  %v1197_v23 = vadd.f32 %v2484_v18, %v878_v16 }
 0x13b   :  { %v752_v20 = vpop.f32.mrf.mxu0  ;;  %v880_v21 = vpop.f32.mrf.mxu1 }
 0x13c   :  { %1989 = vst [vmem:[#allocation3 + $0x30] sm:$0xff] %v1857_v17   ;;  %2005 = vst [vmem:[#allocation3 + $0xb0] sm:$0xff] %v1937_v19   ;;  %v1229_v30 = vmax.f32 %v1165_v22, 0.0  ;;  %v1261_v31 = vmax.f32 %v1197_v23, 0.0 }
 0x13d   :  { %v753_v24 = vpop.f32.mrf.mxu0  ;;  %v881_v25 = vpop.f32.mrf.mxu1 }
 0x13e   :  { %v1166_v26 = vadd.f32 %v2484_v18, %v753_v24  ;;  %v1198_v27 = vadd.f32 %v2484_v18, %v881_v25 }
 0x13f   :  { %v755_v28 = vpop.f32.mrf.mxu0  ;;  %v883_v29 = vpop.f32.mrf.mxu1 }
 0x140   :  { %v1230_v32 = vmax.f32 %v1166_v26, 0.0  ;;  %v1262_v33 = vmax.f32 %v1198_v27, 0.0 }
 0x141   :  { %v758_v34 = vpop.f32.mrf.mxu0  ;;  %v886_v35 = vpop.f32.mrf.mxu1 }
 0x142   :  { %v1862_v36 = vpack.c.bf16 %v1230_v32, %v1229_v30  ;;  %v1942_v37 = vpack.c.bf16 %v1262_v33, %v1261_v31  ;;  %v1167_v40 = vadd.f32 %v2484_v18, %v758_v34  ;;  %v1199_v41 = vadd.f32 %v2484_v18, %v886_v35 }
 0x143   :  { %v760_v38 = vpop.f32.mrf.mxu0  ;;  %v888_v39 = vpop.f32.mrf.mxu1 }
 0x144   :  { %1990 = vst [vmem:[#allocation3 + $0x38] sm:$0xff] %v1862_v36   ;;  %2006 = vst [vmem:[#allocation3 + $0xb8] sm:$0xff] %v1942_v37   ;;  %v1231_v48 = vmax.f32 %v1167_v40, 0.0  ;;  %v1263_v49 = vmax.f32 %v1199_v41, 0.0 }
 0x145   :  { %v761_v42 = vpop.f32.mrf.mxu0  ;;  %v889_v43 = vpop.f32.mrf.mxu1 }
 0x146   :  { %v1168_v44 = vadd.f32 %v2484_v18, %v761_v42  ;;  %v1200_v45 = vadd.f32 %v2484_v18, %v889_v43 }
 0x147   :  { %v763_v46 = vpop.f32.mrf.mxu0  ;;  %v891_v47 = vpop.f32.mrf.mxu1 }
 0x148   :  { %v1232_v50 = vmax.f32 %v1168_v44, 0.0  ;;  %v1264_v51 = vmax.f32 %v1200_v45, 0.0 }
 0x149   :  { %v766_v52 = vpop.f32.mrf.mxu0  ;;  %v894_v53 = vpop.f32.mrf.mxu1 }
 0x14a   :  { %v1867_v54 = vpack.c.bf16 %v1232_v50, %v1231_v48  ;;  %v1947_v55 = vpack.c.bf16 %v1264_v51, %v1263_v49  ;;  %v1169_v58 = vadd.f32 %v2484_v18, %v766_v52  ;;  %v1201_v59 = vadd.f32 %v2484_v18, %v894_v53 }
 0x14b   :  { %v768_v56 = vpop.f32.mrf.mxu0  ;;  %v896_v57 = vpop.f32.mrf.mxu1 }
 0x14c   :  { %1991 = vst [vmem:[#allocation3 + $0x40] sm:$0xff] %v1867_v54   ;;  %2007 = vst [vmem:[#allocation3 + $0xc0] sm:$0xff] %v1947_v55   ;;  %v1233_v2 = vmax.f32 %v1169_v58, 0.0  ;;  %v1265_v3 = vmax.f32 %v1201_v59, 0.0 }
 0x14d   :  { %v769_v60 = vpop.f32.mrf.mxu0  ;;  %v897_v61 = vpop.f32.mrf.mxu1 }
 0x14e   :  { %v1170_v62 = vadd.f32 %v2484_v18, %v769_v60  ;;  %v1202_v63 = vadd.f32 %v2484_v18, %v897_v61 }
 0x14f   :  { %v771_v0 = vpop.f32.mrf.mxu0  ;;  %v899_v1 = vpop.f32.mrf.mxu1 }
 0x150   :  { %v1234_v4 = vmax.f32 %v1170_v62, 0.0  ;;  %v1266_v5 = vmax.f32 %v1202_v63, 0.0 }
 0x151   :  { %v774_v6 = vpop.f32.mrf.mxu0  ;;  %v902_v7 = vpop.f32.mrf.mxu1 }
 0x152   :  { %v1872_v8 = vpack.c.bf16 %v1234_v4, %v1233_v2  ;;  %v1952_v9 = vpack.c.bf16 %v1266_v5, %v1265_v3  ;;  %v1171_v12 = vadd.f32 %v2484_v18, %v774_v6  ;;  %v1203_v13 = vadd.f32 %v2484_v18, %v902_v7 }
 0x153   :  { %v776_v10 = vpop.f32.mrf.mxu0  ;;  %v904_v11 = vpop.f32.mrf.mxu1 }
 0x154   :  { %1992 = vst [vmem:[#allocation3 + $0x48] sm:$0xff] %v1872_v8   ;;  %2008 = vst [vmem:[#allocation3 + $0xc8] sm:$0xff] %v1952_v9   ;;  %v1235_v21 = vmax.f32 %v1171_v12, 0.0  ;;  %v1267_v22 = vmax.f32 %v1203_v13, 0.0 }
 0x155   :  { %v777_v14 = vpop.f32.mrf.mxu0  ;;  %v905_v15 = vpop.f32.mrf.mxu1 }
 0x156   :  { %v1172_v16 = vadd.f32 %v2484_v18, %v777_v14  ;;  %v1204_v17 = vadd.f32 %v2484_v18, %v905_v15 }
 0x157   :  { %v779_v19 = vpop.f32.mrf.mxu0  ;;  %v907_v20 = vpop.f32.mrf.mxu1 }
 0x158   :  { %v1236_v23 = vmax.f32 %v1172_v16, 0.0  ;;  %v1268_v24 = vmax.f32 %v1204_v17, 0.0 }
 0x159   :  { %v782_v25 = vpop.f32.mrf.mxu0  ;;  %v910_v26 = vpop.f32.mrf.mxu1 }
 0x15a   :  { %v1877_v27 = vpack.c.bf16 %v1236_v23, %v1235_v21  ;;  %v1957_v28 = vpack.c.bf16 %v1268_v24, %v1267_v22  ;;  %v1173_v31 = vadd.f32 %v2484_v18, %v782_v25  ;;  %v1205_v32 = vadd.f32 %v2484_v18, %v910_v26 }
 0x15b   :  { %v784_v29 = vpop.f32.mrf.mxu0  ;;  %v912_v30 = vpop.f32.mrf.mxu1 }
 0x15c   :  { %1993 = vst [vmem:[#allocation3 + $0x50] sm:$0xff] %v1877_v27   ;;  %2009 = vst [vmem:[#allocation3 + $0xd0] sm:$0xff] %v1957_v28   ;;  %v1237_v39 = vmax.f32 %v1173_v31, 0.0  ;;  %v1269_v40 = vmax.f32 %v1205_v32, 0.0 }
 0x15d   :  { %v785_v33 = vpop.f32.mrf.mxu0  ;;  %v913_v34 = vpop.f32.mrf.mxu1 }
 0x15e   :  { %v1174_v35 = vadd.f32 %v2484_v18, %v785_v33  ;;  %v1206_v36 = vadd.f32 %v2484_v18, %v913_v34 }
 0x15f   :  { %v787_v37 = vpop.f32.mrf.mxu0  ;;  %v915_v38 = vpop.f32.mrf.mxu1 }
 0x160   :  { %v1238_v41 = vmax.f32 %v1174_v35, 0.0  ;;  %v1270_v42 = vmax.f32 %v1206_v36, 0.0 }
 0x161   :  { %v790_v43 = vpop.f32.mrf.mxu0  ;;  %v918_v44 = vpop.f32.mrf.mxu1 }
 0x162   :  { %v1882_v45 = vpack.c.bf16 %v1238_v41, %v1237_v39  ;;  %v1962_v46 = vpack.c.bf16 %v1270_v42, %v1269_v40  ;;  %v1175_v49 = vadd.f32 %v2484_v18, %v790_v43  ;;  %v1207_v50 = vadd.f32 %v2484_v18, %v918_v44 }
 0x163   :  { %v792_v47 = vpop.f32.mrf.mxu0  ;;  %v920_v48 = vpop.f32.mrf.mxu1 }
 0x164   :  { %1994 = vst [vmem:[#allocation3 + $0x58] sm:$0xff] %v1882_v45   ;;  %2010 = vst [vmem:[#allocation3 + $0xd8] sm:$0xff] %v1962_v46   ;;  %v1239_v57 = vmax.f32 %v1175_v49, 0.0  ;;  %v1271_v58 = vmax.f32 %v1207_v50, 0.0 }
 0x165   :  { %v793_v51 = vpop.f32.mrf.mxu0  ;;  %v921_v52 = vpop.f32.mrf.mxu1 }
 0x166   :  { %v1176_v53 = vadd.f32 %v2484_v18, %v793_v51  ;;  %v1208_v54 = vadd.f32 %v2484_v18, %v921_v52 }
 0x167   :  { %v795_v55 = vpop.f32.mrf.mxu0  ;;  %v923_v56 = vpop.f32.mrf.mxu1 }
 0x168   :  { %v1240_v59 = vmax.f32 %v1176_v53, 0.0  ;;  %v1272_v60 = vmax.f32 %v1208_v54, 0.0 }
 0x169   :  { %v798_v61 = vpop.f32.mrf.mxu0  ;;  %v926_v62 = vpop.f32.mrf.mxu1 }
 0x16a   :  { %v1887_v63 = vpack.c.bf16 %v1240_v59, %v1239_v57  ;;  %v1967_v0 = vpack.c.bf16 %v1272_v60, %v1271_v58  ;;  %v1177_v3 = vadd.f32 %v2484_v18, %v798_v61  ;;  %v1209_v4 = vadd.f32 %v2484_v18, %v926_v62 }
 0x16b   :  { %v800_v1 = vpop.f32.mrf.mxu0  ;;  %v928_v2 = vpop.f32.mrf.mxu1 }
 0x16c   :  { %1995 = vst [vmem:[#allocation3 + $0x60] sm:$0xff] %v1887_v63   ;;  %2011 = vst [vmem:[#allocation3 + $0xe0] sm:$0xff] %v1967_v0   ;;  %v1241_v11 = vmax.f32 %v1177_v3, 0.0  ;;  %v1273_v12 = vmax.f32 %v1209_v4, 0.0 }
 0x16d   :  { %v801_v5 = vpop.f32.mrf.mxu0  ;;  %v929_v6 = vpop.f32.mrf.mxu1 }
 0x16e   :  { %v1178_v7 = vadd.f32 %v2484_v18, %v801_v5  ;;  %v1210_v8 = vadd.f32 %v2484_v18, %v929_v6 }
 0x16f   :  { %v803_v9 = vpop.f32.mrf.mxu0  ;;  %v931_v10 = vpop.f32.mrf.mxu1 }
 0x170   :  { %v1242_v13 = vmax.f32 %v1178_v7, 0.0  ;;  %v1274_v14 = vmax.f32 %v1210_v8, 0.0 }
 0x171   :  { %v806_v15 = vpop.f32.mrf.mxu0  ;;  %v934_v16 = vpop.f32.mrf.mxu1 }
 0x172   :  { %v1892_v17 = vpack.c.bf16 %v1242_v13, %v1241_v11  ;;  %v1972_v19 = vpack.c.bf16 %v1274_v14, %v1273_v12  ;;  %v1179_v22 = vadd.f32 %v2484_v18, %v806_v15  ;;  %v1211_v23 = vadd.f32 %v2484_v18, %v934_v16 }
 0x173   :  { %v808_v20 = vpop.f32.mrf.mxu0  ;;  %v936_v21 = vpop.f32.mrf.mxu1 }
 0x174   :  { %1996 = vst [vmem:[#allocation3 + $0x68] sm:$0xff] %v1892_v17   ;;  %2012 = vst [vmem:[#allocation3 + $0xe8] sm:$0xff] %v1972_v19   ;;  %v1243_v30 = vmax.f32 %v1179_v22, 0.0  ;;  %v1275_v31 = vmax.f32 %v1211_v23, 0.0 }
 0x175   :  { %v809_v24 = vpop.f32.mrf.mxu0  ;;  %v937_v25 = vpop.f32.mrf.mxu1 }
 0x176   :  { %v1180_v26 = vadd.f32 %v2484_v18, %v809_v24  ;;  %v1212_v27 = vadd.f32 %v2484_v18, %v937_v25 }
 0x177   :  { %v811_v28 = vpop.f32.mrf.mxu0  ;;  %v939_v29 = vpop.f32.mrf.mxu1 }
 0x178   :  { %v1244_v32 = vmax.f32 %v1180_v26, 0.0  ;;  %v1276_v33 = vmax.f32 %v1212_v27, 0.0 }
 0x179   :  { %v814_v34 = vpop.f32.mrf.mxu0  ;;  %v942_v35 = vpop.f32.mrf.mxu1 }
 0x17a   :  { %v1897_v36 = vpack.c.bf16 %v1244_v32, %v1243_v30  ;;  %v1977_v37 = vpack.c.bf16 %v1276_v33, %v1275_v31  ;;  %v1181_v40 = vadd.f32 %v2484_v18, %v814_v34  ;;  %v1213_v41 = vadd.f32 %v2484_v18, %v942_v35 }
 0x17b   :  { %v816_v38 = vpop.f32.mrf.mxu0  ;;  %v944_v39 = vpop.f32.mrf.mxu1 }
 0x17c   :  { %1997 = vst [vmem:[#allocation3 + $0x70] sm:$0xff] %v1897_v36   ;;  %2013 = vst [vmem:[#allocation3 + $0xf0] sm:$0xff] %v1977_v37   ;;  %v1245_v48 = vmax.f32 %v1181_v40, 0.0  ;;  %v1277_v49 = vmax.f32 %v1213_v41, 0.0 }
 0x17d   :  { %v817_v42 = vpop.f32.mrf.mxu0  ;;  %v945_v43 = vpop.f32.mrf.mxu1 }
 0x17e   :  { %v1182_v44 = vadd.f32 %v2484_v18, %v817_v42  ;;  %v1214_v45 = vadd.f32 %v2484_v18, %v945_v43 }
 0x17f   :  { %v819_v46 = vpop.f32.mrf.mxu0  ;;  %v947_v47 = vpop.f32.mrf.mxu1 }
 0x180   :  { %v1246_v50 = vmax.f32 %v1182_v44, 0.0  ;;  %v1278_v51 = vmax.f32 %v1214_v45, 0.0 }
 0x182   :  { %v1902_v52 = vpack.c.bf16 %v1246_v50, %v1245_v48  ;;  %v1982_v53 = vpack.c.bf16 %v1278_v51, %v1277_v49 }
 0x184   :  { %1998 = vst [vmem:[#allocation3 + $0x78] sm:$0xff] %v1902_v52   ;;  %2014 = vst [vmem:[#allocation3 + $0xf8] sm:$0xff] %v1982_v53  }
 0x185   :  { %2174 = shalt.err (!%p2171_p4)
}
 0x186   :  { %s2187_s8 = smov 64   ;;  %s2188_s9 = smov 4  }
 0x187   :  { %1610 = dma.vmem_to_hbm [thread:$0]  %s1605_s2, 4096, %s2556_s3, [#allocation4], %s2187_s8, %s2187_s8, %s2188_s9  }
 0x188   :  { %2183 = dma.done.wait [#allocation4], 4096  }
 0x189   :  { %2184 = vsyncadd [#allocation4], 4294963200 }
 0x18a   :  { %1614 = vsyncpa [#allocation4], 1 }

</bundles_post_ra>
